<compile_context>
chip_gen: v7x
topology: tpu7x:2x2x1
jax: 0.10.0
libtpu: 0.0.40
codegen_flags: <defaults>
</compile_context>

<pallas_src>
import jax
import jax.numpy as jnp
from jax.experimental import pallas as pl
from jax.experimental.pallas import tpu as pltpu


def _luong_kernel(p_ref, v_ref, ctx_ref, attn_ref):
    # p_ref:    (TB, H)     projected query rows, p = q @ W
    # v_ref:    (TB, S, H)  values
    # ctx_ref:  (TB, H)     context output
    # attn_ref: (TB, S)     attention weights (lane-dense; wrapper appends unit dim)
    v = v_ref[...].astype(jnp.float32)
    p = p_ref[...].astype(jnp.float32)

    # score[b,s] = sum_h v[b,s,h] * p[b,h]
    # VPU broadcast-multiply + lane reduce: exact f32 on every chip, avoids M=1
    # batched MXU matmuls (<=1/8 MXU row utilization, per-batch push/pop) and
    # v5e's emulated f32 matmul; it hides under the values DMA (HBM-bound).
    score = jnp.sum(v * p[:, None, :], axis=-1)            # (TB, S)

    # softmax over S (lane axis), exact f32; exact divide (off the critical path).
    m = jnp.max(score, axis=-1, keepdims=True)
    e = jnp.exp(score - m)
    attn = e / jnp.sum(e, axis=-1, keepdims=True)          # (TB, S)

    # ctx[b,h] = sum_s attn[b,s] * v[b,s,h]
    ctx = jnp.sum(v * attn[:, :, None], axis=1)            # (TB, H)

    ctx_ref[...] = ctx.astype(ctx_ref.dtype)
    attn_ref[...] = attn.astype(attn_ref.dtype)


def _pick_tb(B, S, H, itemsize):
    """Batch rows per grid step.

    Budgets ALL double-buffered operands (values + p + ctx + attn) per row so the
    blocks stay well under a chip-safe scoped-VMEM ceiling (in-kernel f32
    temporaries are covered by the headroom in _vmem_limit_bytes), keeps TB a
    sublane-granule multiple (or == B) so the rank-2 blocks are (8,128)-legal
    with unmasked stores, and targets >= 4 grid steps when B allows so DMA-in /
    compute / DMA-out overlap and both v7x TensorCores get balanced work.
    """
    per_row = (S * H + 2 * H + S) * itemsize       # one buffer's worth, one batch row
    budget = 3 * 1024 * 1024                       # per-buffer block budget (all chips)
    tb = max(1, budget // max(per_row, 1))
    if B >= 8:
        tb = min(tb, max(1, B // 4))               # keep >= 4 grid steps
    tb = min(tb, B)
    if tb < B:
        granule = 8 if itemsize >= 4 else 16       # f32 / bf16 sublane packing
        tb = max(granule, (tb // granule) * granule)
        tb = min(tb, B)                            # == B is always a legal block dim
    return int(tb)


def _vmem_limit_bytes(TB, S, H, itemsize):
    """Scoped-VMEM request: double-buffered blocks + in-kernel f32 temporaries,
    capped per chip (v7x: 64 MiB per TensorCore; v5e/v6e: 128 MiB)."""
    blocks = 2 * TB * (S * H + 2 * H + S) * itemsize   # double-buffered operands
    temps = 3 * TB * S * H * 4                         # f32 products / upcast copies
    need = blocks + temps + (2 << 20)
    cap = 48 << 20                                     # always grantable, incl. v7x
    try:
        phys = getattr(pltpu.get_tpu_info(), "vmem_capacity_bytes", None)
        if phys:
            cap = max(cap, int(phys) - (32 << 20))     # leave compiler headroom
    except Exception:
        pass                                           # e.g. interpret mode / no TPU info
    return int(min(max(32 << 20, need), cap))


def luong_attention_general(query, values, weight, bias):
    """query: (1,B,H); values: (B,S,H); weight: (H,H) torch-Linear weight (out,in); bias: (H,)."""
    q = jnp.squeeze(query, 0)                           # (B, H)
    B, S, H = values.shape

    # p_b = q_b @ W  (rows of `weight` are output features, matching torch Linear).
    # The bias contribution bias.q_b is constant over S -> cancels in the softmax,
    # and the context uses the raw values, so bias drops out of both outputs.
    del bias
    p = jnp.dot(q, weight, precision=jax.lax.Precision.HIGHEST).astype(values.dtype)  # (B, H)

    itemsize = jnp.dtype(values.dtype).itemsize
    TB = _pick_tb(B, S, H, itemsize)
    grid = (pl.cdiv(B, TB),)

    ctx, attn = pl.pallas_call(
        _luong_kernel,
        out_shape=(
            jax.ShapeDtypeStruct((B, H), values.dtype),   # context
            jax.ShapeDtypeStruct((B, S), values.dtype),   # attention (lane-dense)
        ),
        grid=grid,
        in_specs=[
            pl.BlockSpec((TB, H), lambda b: (b, 0)),      # projected query rows
            pl.BlockSpec((TB, S, H), lambda b: (b, 0, 0)),  # values
        ],
        out_specs=(
            pl.BlockSpec((TB, H), lambda b: (b, 0)),
            pl.BlockSpec((TB, S), lambda b: (b, 0)),
        ),
        compiler_params=pltpu.CompilerParams(
            dimension_semantics=("parallel",),
            vmem_limit_bytes=_vmem_limit_bytes(TB, S, H, itemsize),
        ),
    )(p, values)

    # (B, S) -> (B, S, 1): pure trailing-unit reshape (no relayout / transpose),
    # matching the PyTorch attention_weights shape.
    return ctx, attn[..., None]


def _reference(query, values, weight, bias):
    hp = jax.lax.Precision.HIGHEST
    q = jnp.squeeze(query, 0)                                        # (B, H)
    wv = jnp.einsum('bsh,oh->bso', values, weight, precision=hp) + bias   # Linear: x @ W^T + b
    score = jnp.einsum('bso,bo->bs', wv, q, precision=hp)[..., None]      # (B, S, 1)
    attn = jax.nn.softmax(score, axis=1)
    ctx = jnp.sum(attn * values, axis=1)
    return ctx, attn


if __name__ == "__main__":
    B, S, H = 2, 8, 32
    key = jax.random.PRNGKey(0)
    k_q, k_v, k_w, k_b = jax.random.split(key, 4)

    query = jax.random.normal(k_q, (1, B, H), dtype=jnp.float32)
    values = jax.random.normal(k_v, (B, S, H), dtype=jnp.float32)
    # deterministic "Linear(hidden_size, hidden_size)" params (weight is (out, in))
    weight = jax.random.normal(k_w, (H, H), dtype=jnp.float32) * (1.0 / jnp.sqrt(H))
    bias = jax.random.normal(k_b, (H,), dtype=jnp.float32) * 0.01

    ctx, attn = luong_attention_general(query, values, weight, bias)
    jax.block_until_ready((ctx, attn))

    ctx_ref, attn_ref = _reference(query, values, weight, bias)
    assert ctx.shape == (B, H) and attn.shape == (B, S, 1)
    # Exact f32 math throughout (exact divide, highest-precision projection), so
    # only association-order rounding remains.
    assert jnp.allclose(ctx, ctx_ref, atol=1e-4, rtol=1e-4), \
        float(jnp.max(jnp.abs(ctx - ctx_ref)))
    assert jnp.allclose(attn, attn_ref, atol=1e-4, rtol=1e-4), \
        float(jnp.max(jnp.abs(attn - attn_ref)))

    print("KERNEL_OK")
</pallas_src>

<mosaic_0001>
module attributes {stable_mosaic.version = 11 : i64} {
  func.func @_luong_kernel(%arg0: i32, %arg1: memref<2x32xf32, #tpu.memory_space<vmem>>, %arg2: memref<2x8x32xf32, #tpu.memory_space<vmem>>, %arg3: memref<2x32xf32, #tpu.memory_space<vmem>>, %arg4: memref<2x8xf32, #tpu.memory_space<vmem>>) attributes {dimension_semantics = [#tpu.dimension_semantics<parallel>], iteration_bounds = array<i64: 1>, scalar_prefetch = 0 : i64, scratch_operands = 0 : i64, tpu.core_type = #tpu.core_type<tc>, window_params = [{transform_indices = @transform_0, window_bounds = array<i64: 2, 32>}, {transform_indices = @transform_1, window_bounds = array<i64: 2, 8, 32>}, {transform_indices = @transform_2, window_bounds = array<i64: 2, 32>}, {transform_indices = @transform_3, window_bounds = array<i64: 2, 8>}]} {
    %c0 = arith.constant 0 : index
    %c0_0 = arith.constant 0 : index
    %c0_1 = arith.constant 0 : index
    %0 = vector.load %arg2[%c0, %c0_0, %c0_1] : memref<2x8x32xf32, #tpu.memory_space<vmem>>, vector<2x8x32xf32>
    %c0_2 = arith.constant 0 : index
    %c0_3 = arith.constant 0 : index
    %1 = vector.load %arg1[%c0_2, %c0_3] : memref<2x32xf32, #tpu.memory_space<vmem>>, vector<2x32xf32>
    %2 = vector.shape_cast %1 : vector<2x32xf32> to vector<2x1x32xf32>
    %3 = vector.broadcast %2 : vector<2x1x32xf32> to vector<2x8x32xf32>
    %4 = arith.mulf %0, %3 : vector<2x8x32xf32>
    %cst = arith.constant dense<0.000000e+00> : vector<2x8xf32>
    %5 = vector.multi_reduction <add>, %4, %cst [2] : vector<2x8x32xf32> to vector<2x8xf32>
    %cst_4 = arith.constant dense<0xFF800000> : vector<2xf32>
    %6 = vector.multi_reduction <maximumf>, %5, %cst_4 [1] : vector<2x8xf32> to vector<2xf32>
    %7 = vector.shape_cast %6 : vector<2xf32> to vector<2x1xf32>
    %8 = vector.broadcast %7 : vector<2x1xf32> to vector<2x8xf32>
    %9 = arith.subf %5, %8 : vector<2x8xf32>
    %10 = math.exp %9 : vector<2x8xf32>
    %cst_5 = arith.constant dense<0.000000e+00> : vector<2xf32>
    %11 = vector.multi_reduction <add>, %10, %cst_5 [1] : vector<2x8xf32> to vector<2xf32>
    %12 = vector.shape_cast %11 : vector<2xf32> to vector<2x1xf32>
    %13 = vector.broadcast %12 : vector<2x1xf32> to vector<2x8xf32>
    %14 = arith.divf %10, %13 : vector<2x8xf32>
    %15 = vector.shape_cast %14 : vector<2x8xf32> to vector<2x8x1xf32>
    %16 = vector.broadcast %15 : vector<2x8x1xf32> to vector<2x8x32xf32>
    %17 = arith.mulf %0, %16 : vector<2x8x32xf32>
    %cst_6 = arith.constant dense<0.000000e+00> : vector<2x32xf32>
    %18 = vector.multi_reduction <add>, %17, %cst_6 [1] : vector<2x8x32xf32> to vector<2x32xf32>
    %c0_7 = arith.constant 0 : index
    %c0_8 = arith.constant 0 : index
    %19 = vector.load %arg3[%c0_7, %c0_8] : memref<2x32xf32, #tpu.memory_space<vmem>>, vector<2x32xf32>
    tpu.vector_store %arg3[%c0_7, %c0_8], %18 {strides = array<i32>} : memref<2x32xf32, #tpu.memory_space<vmem>>, vector<2x32xf32>,
    %c0_9 = arith.constant 0 : index
    %c0_10 = arith.constant 0 : index
    %20 = vector.load %arg4[%c0_9, %c0_10] : memref<2x8xf32, #tpu.memory_space<vmem>>, vector<2x8xf32>
    tpu.vector_store %arg4[%c0_9, %c0_10], %14 {strides = array<i32>} : memref<2x8xf32, #tpu.memory_space<vmem>>, vector<2x8xf32>,
    return
  }
  func.func @transform_0(%arg0: i32) -> (i32, i32) {
    %c0_i32 = arith.constant 0 : i32
    %c0_i32_0 = arith.constant 0 : i32
    return %arg0, %c0_i32 : i32, i32
  }
  func.func @transform_1(%arg0: i32) -> (i32, i32, i32) {
    %c0_i32 = arith.constant 0 : i32
    %c0_i32_0 = arith.constant 0 : i32
    %c0_i32_1 = arith.constant 0 : i32
    return %arg0, %c0_i32, %c0_i32_0 : i32, i32, i32
  }
  func.func @transform_2(%arg0: i32) -> (i32, i32) {
    %c0_i32 = arith.constant 0 : i32
    %c0_i32_0 = arith.constant 0 : i32
    return %arg0, %c0_i32 : i32, i32
  }
  func.func @transform_3(%arg0: i32) -> (i32, i32) {
    %c0_i32 = arith.constant 0 : i32
    %c0_i32_0 = arith.constant 0 : i32
    return %arg0, %c0_i32 : i32, i32
  }
}

</mosaic_0001>

<bundles_post_ra>
// kernel: tpu_custom_call.1
= control target key start
LH: loop header
LB: loop body
LE: loop exit
PB: predicated region body
PF: predicated region fallthrough
CT: control target
= control target key end

     0   :  { %9 = vsyncpa [#allocation3], 0  ;;  %s448_s0 = inlined_call_operand.hbm [shape: f32[2,32], index: 0, kind: input, shape index: {}]   ;;  %s449_s1 = inlined_call_operand.hbm [shape: f32[2,8,32], index: 1, kind: input, shape index: {}]   ;;  %s450_s2 = inlined_call_operand.hbm [shape: f32[2,32], index: 2, kind: output, shape index: {0}]   ;;  %s451_s3 = inlined_call_operand.hbm [shape: f32[2,8], index: 3, kind: output, shape index: {1}]  }
   0x1   :  { %10 = vsyncpa [#allocation6], 0 }
   0x2   :  { %11 = vsyncpa [#allocation4], 0 }
   0x3   :  { %12 = vsyncpa [#allocation9], 0  ;;  %s346_s12 = smov [#allocation2]   ;;  %s347_s14 = smov [#allocation5]  }
   0x4   :  { %s19_s13 = sshll.u32 %s346_s12, 4  ;;  %s28_s15 = sshll.u32 %s347_s14, 4  ;;  %s20_s13 = int_to_ptr.vmem [resolvable:$true] %s19_s13  ;;  %s374_s15 = int_to_ptr.vmem [resolvable:$true] %s28_s15 }
   0x5   :  { %s250_s18 = scalar_lea.hbm %s448_s0, 32 }
   0x6   :  { %p251_p0 = scmp.ne.s32.totalorder %s448_s0, %s250_s18  ;;  %p254_p1 = scmp.lt.u32.totalorder %s250_s18, %s448_s0 }
   0x8   :  { %p256_p2 = pnand %p254_p1, %p251_p0 }
   0xa   :  { %259 = shalt.err (!%p256_p2)
}
   0xb   :  { %s260_s23 = scalar_lea.vmem %s20_s13, 32  ;;  %p265_p4 = scmp.lt.s32.totalorder %s20_s13, %s20_s13 }
   0xc   :  { %p261_p3 = scmp.ne.s32.totalorder %s20_s13, %s260_s23  ;;  %p266_p5 = scmp.lt.s32.totalorder %s260_s23, %s260_s23 }
   0xe   :  { %p267_p6 = por %p266_p5, %p265_p4 }
  0x10   :  { %p268_p7 = pnand %p267_p6, %p261_p3 }
  0x12   :  { %271 = shalt.err (!%p268_p7)
}
  0x13   :  { %22 = dma.hbm_to_vmem [thread:$0]  %s448_s0, 32, %s20_s13, [#allocation3]  }
  0x14   :  { %s272_s28 = scalar_lea.hbm %s449_s1, 256 }
  0x15   :  { %p273_p8 = scmp.ne.s32.totalorder %s449_s1, %s272_s28  ;;  %p276_p9 = scmp.lt.u32.totalorder %s272_s28, %s449_s1 }
  0x17   :  { %p278_p10 = pnand %p276_p9, %p273_p8 }
  0x19   :  { %281 = shalt.err (!%p278_p10)
}
  0x1a   :  { %s282_s6 = scalar_lea.vmem %s374_s15, 256  ;;  %p287_p12 = scmp.lt.s32.totalorder %s374_s15, %s374_s15 }
  0x1b   :  { %p283_p11 = scmp.ne.s32.totalorder %s374_s15, %s282_s6  ;;  %p288_p13 = scmp.lt.s32.totalorder %s282_s6, %s282_s6 }
  0x1d   :  { %p289_p0 = por %p288_p13, %p287_p12 }
  0x1f   :  { %p290_p1 = pnand %p289_p0, %p283_p11 }
  0x21   :  { %293 = shalt.err (!%p290_p1)
}
  0x22   :  { %s348_s0 = smov 128   ;;  %s349_s7 = smov 8  }
  0x23   :  { %34 = dma.hbm_to_vmem [thread:$0]  %s449_s1, 256, %s374_s15, [#allocation6], %s348_s0, %s348_s0, %s349_s7  }
  0x24   :  { %338 = dma.done.wait [#allocation3], 32  }
  0x25   :  { %339 = vsyncadd [#allocation3], 4294967264 }
  0x26   :  { %340 = dma.done.wait [#allocation6], 256  }
  0x27   :  { %341 = vsyncadd [#allocation6], 4294967040  ;;  %v56_v0 = vlaneseq  ;;  %v350_v1 = vmov 1966171168   ;;  %v41_v12 = vld [vmem:[#allocation5] sm:$0xff]  ;;  %vm79_vm0 = vcmask 261120  }
  0x28   :  { %v54_v2 = vunpack.c.l.s4 %v350_v1  ;;  %v231_v9 = vld.sshfl [vmem:[#allocation2] sm:$0x11 pattern:$0x75316420]  ;;  %v42_v15 = vld [vmem:[#allocation5 + $0x8] sm:$0xff]  ;;  %vm98_vm1 = vcmask 1041409  }
  0x29   :  { %v57_v3 = vshrl.u32 %v56_v0, 7  ;;  %v89_v4 = vand.u32 127, %v56_v0  ;;  %v52_v10 = vcombine.high %v231_v9, %v231_v9  ;;  %vm101_vm2 = vcmask 58368   ;;  %s352_s1 = smov [#allocation8]  }
  0x2a   :  { %v55_v5 = vunpack.c.0.s8 %v54_v2  ;;  %v351_v27 = vmov 0   ;;  %s217_s10 = sshll.u32 %s352_s1, 4  ;;  %s218_s10 = int_to_ptr.vmem [resolvable:$true] %s217_s10 }
  0x2b   :  { %v405_v6 = vsub.s32 %v89_v4, %v57_v3  ;;  %v69_v8 = vsub.s32 0, %v57_v3  ;;  %241 = vset.pattern.permute.xlu0 %v351_v27  ;;  %240 = vset.pattern.permute.xlu1 %v351_v27  ;;  %v112_v28 = vsub.s32 1, %v57_v3  ;;  %s294_s11 = scalar_lea.vmem %s218_s10, 32  ;;  %p299_p3 = scmp.lt.s32.totalorder %s218_s10, %s218_s10 }
  0x2c   :  { %v58_v7 = vsub.s32 %v55_v5, %v57_v3  ;;  %p295_p2 = scmp.ne.s32.totalorder %s218_s10, %s294_s11  ;;  %p300_p4 = scmp.lt.s32.totalorder %s294_s11, %s294_s11 }
  0x2e   :  { %v59_v11 = vrot.slane %v231_v9, %v58_v7  ;;  %v66_v14 = vrot.slane %v52_v10, %v58_v7  ;;  %p301_p5 = por %p300_p4, %p299_p3 }
  0x30   :  { %v70_v13 = vrot.slane %v59_v11, %v69_v8  ;;  %v74_v17 = vrot.slane %v66_v14, %v69_v8  ;;  %p302_p6 = pnand %p301_p5, %p295_p2 }
  0x32   :  { %v77_v16 = vmul.f32 %v70_v13, %v41_v12  ;;  %v78_v19 = vmul.f32 %v74_v17, %v42_v15 }
  0x34   :  { %v80_v18 = vsel %vm79_vm0, %v77_v16, 0.0  ;;  %v83_v20 = vsel %vm79_vm0, %v78_v19, 0.0 }
  0x35   :  { %81 = vadd.xlane.f32.xlu0 %v80_v18 }
  0x39   :  { %84 = vadd.xlane.f32.xlu0 %v83_v20 }
  0xc2   :  { %v82_v21 = vpop.xlane.xlu0 %81 }
  0xc3   :  { %v93_v23 = vrot.slane %v82_v21, %v405_v6 }
  0xc6   :  { %v85_v22 = vpop.xlane.xlu0 %84 }
  0xc7   :  { %v97_v24 = vrot.slane %v85_v22, %v405_v6 }
  0xc9   :  { %v99_v25 = vsel %vm98_vm1, %v97_v24, %v93_v23 }
  0xca   :  { %v102_v26 = vsel %vm101_vm2, %v99_v25, -inf }
  0xcb   :  { %103 = vmax.xlane.f32.xlu1 %v102_v26 }
 0x158   :  { %v104_v29 = vpop.xlane.xlu1 %103 }
 0x159   :  { %v109_v30 = vrot.slane %v104_v29, %v69_v8  ;;  %v113_v31 = vrot.slane %v104_v29, %v112_v28 }
 0x15b   :  { %v116_v32 = vsub.f32 %v82_v21, %v109_v30  ;;  %v117_v33 = vsub.f32 %v85_v22, %v113_v31 }
 0x15d   :  { %v118_v34 = vmul.f32 1.442695, %v116_v32  ;;  %v120_v35 = vmul.f32 1.442695, %v117_v33 }
 0x15f   :  { %242 = vpow2.f32 %v118_v34 }
 0x160   :  { %244 = vpow2.f32 %v120_v35 }
 0x169   :  { %v243_v36 = vpop.eup %242 }
 0x16a   :  { %v245_v37 = vpop.eup %244  ;;  %125 = vperm.xlu1 %240, %v243_v36  }
 0x16b   :  { %128 = vperm.xlu0 %241, %v245_v37  }
 0x1e9   :  { %v126_v38 = vpop.permute.xlu1 %125 }
 0x1ea   :  { %v129_v39 = vpop.permute.xlu0 %128  ;;  %v133_v40 = vrot.slane %v126_v38, %v405_v6 }
 0x1eb   :  { %v137_v41 = vrot.slane %v129_v39, %v405_v6 }
 0x1ed   :  { %v138_v42 = vsel %vm98_vm1, %v137_v41, %v133_v40 }
 0x1ee   :  { %v140_v43 = vsel %vm101_vm2, %v138_v42, 0.0 }
 0x1ef   :  { %141 = vadd.xlane.f32.xlu1 %v140_v43 }
 0x27c   :  { %v142_v44 = vpop.xlane.xlu1 %141 }
 0x27d   :  { %v147_v45 = vrot.slane %v142_v44, %v69_v8  ;;  %v151_v46 = vrot.slane %v142_v44, %v112_v28 }
 0x27f   :  { %246 = vrcp.f32 %v147_v45 }
 0x280   :  { %248 = vrcp.f32 %v151_v46 }
 0x289   :  { %v247_v47 = vpop.eup %246 }
 0x28a   :  { %v155_v48 = vmul.f32 %v247_v47, %v243_v36  ;;  %v249_v49 = vpop.eup %248 }
 0x28b   :  { %v157_v50 = vmul.f32 %v249_v49, %v245_v37 }
 0x28c   :  { %160 = vperm.xlu0 %241, %v155_v48  }
 0x290   :  { %165 = vperm.xlu0 %241, %v157_v50  }
 0x30b   :  { %v161_v51 = vpop.permute.xlu0 %160 }
 0x30c   :  { %v168_v52 = vmul.f32 %v161_v51, %v41_v12  ;;  %v193_v56 = vrot.slane %v161_v51, %v405_v6 }
 0x30e   :  { %v170_v53 = vsel %vm79_vm0, %v168_v52, 0.0 }
 0x30f   :  { %v171_v54 = vrot.slane %v170_v53, 4  ;;  %v166_v55 = vpop.permute.xlu0 %165 }
 0x310   :  { %v169_v57 = vmul.f32 %v166_v55, %v42_v15  ;;  %v197_v58 = vrot.slane %v166_v55, %v405_v6 }
 0x311   :  { %v172_v59 = vadd.f32 %v171_v54, %v170_v53 }
 0x312   :  { %v177_v60 = vsel %vm79_vm0, %v169_v57, 0.0  ;;  %v198_v61 = vsel %vm98_vm1, %v197_v58, %v193_v56 }
 0x313   :  { %v173_v62 = vrot.slane %v172_v59, 2  ;;  %v178_v63 = vrot.slane %v177_v60, 4  ;;  %200 = vst.msk [vmem:[#allocation8] sm:$0x3] %vm101_vm2, %v198_v61 }
 0x314   :  { %305 = shalt.err (!%p302_p6)
}
 0x315   :  { %s306_s14 = scalar_lea.hbm %s451_s3, 32 }
 0x316   :  { %p307_p7 = scmp.ne.s32.totalorder %s451_s3, %s306_s14  ;;  %p310_p8 = scmp.lt.u32.totalorder %s306_s14, %s451_s3 }
 0x318   :  { %p312_p9 = pnand %p310_p8, %p307_p7 }
 0x31a   :  { %315 = shalt.err (!%p312_p9)
}
 0x31b   :  { %220 = dma.vmem_to_hbm [thread:$0]  %s218_s10, 32, %s451_s3, [#allocation9]   ;;  %v174_v0 = vadd.f32 %v173_v62, %v172_v59  ;;  %v179_v1 = vadd.f32 %v178_v63, %v177_v60  ;;  %vm188_vm3 = vcmask 254976  }
 0x31c   :  { %s353_s21 = smov [#allocation7]  }
 0x31d   :  { %v180_v2 = vrot.slane %v179_v1, 2  ;;  %v175_v3 = vrot.slane %v174_v0, 1  ;;  %s207_s22 = sshll.u32 %s353_s21, 4  ;;  %s208_s22 = int_to_ptr.vmem [resolvable:$true] %s207_s22 }
 0x31e   :  { %s316_s23 = scalar_lea.vmem %s208_s22, 32  ;;  %p321_p11 = scmp.lt.s32.totalorder %s208_s22, %s208_s22 }
 0x31f   :  { %v181_v4 = vadd.f32 %v180_v2, %v179_v1  ;;  %v176_v7 = vadd.f32 %v175_v3, %v174_v0  ;;  %p317_p10 = scmp.ne.s32.totalorder %s208_s22, %s316_s23  ;;  %p322_p12 = scmp.lt.s32.totalorder %s316_s23, %s316_s23 }
 0x321   :  { %v182_v5 = vrot.slane %v181_v4, 1  ;;  %p323_p13 = por %p322_p12, %p321_p11 }
 0x323   :  { %v183_v6 = vadd.f32 %v182_v5, %v181_v4  ;;  %p324_p0 = pnand %p323_p13, %p317_p10 }
 0x325   :  { %v186_v8 = vsel %vm98_vm1, %v183_v6, %v176_v7 }
 0x326   :  { %189 = vst.msk [vmem:[#allocation7] sm:$0x3] %vm188_vm3, %v186_v8 }
 0x327   :  { %327 = shalt.err (!%p324_p0)
}
 0x328   :  { %s328_s25 = scalar_lea.hbm %s450_s2, 32 }
 0x329   :  { %p329_p1 = scmp.ne.s32.totalorder %s450_s2, %s328_s25  ;;  %p332_p2 = scmp.lt.u32.totalorder %s328_s25, %s450_s2 }
 0x32b   :  { %p334_p3 = pnand %p332_p2, %p329_p1 }
 0x32d   :  { %337 = shalt.err (!%p334_p3)
}
 0x32e   :  { %210 = dma.vmem_to_hbm [thread:$0]  %s208_s22, 32, %s450_s2, [#allocation4]  }
 0x32f   :  { %342 = dma.done.wait [#allocation4], 32  }
 0x330   :  { %343 = vsyncadd [#allocation4], 4294967264 }
 0x331   :  { %344 = dma.done.wait [#allocation9], 32  }
 0x332   :  { %345 = vsyncadd [#allocation9], 4294967264 }
 0x333   :  { %227 = vsyncpa [#allocation3], 1 }
 0x334   :  { %228 = vsyncpa [#allocation6], 1 }
 0x335   :  { %229 = vsyncpa [#allocation4], 1 }
 0x336   :  { %230 = vsyncpa [#allocation9], 1 }

</bundles_post_ra>
